<compile_context>
chip_gen: v7x
topology: tpu7x:2x2x1
jax: 0.10.0
libtpu: 0.0.40
codegen_flags: <defaults>
</compile_context>

<pallas_src>
import jax
import jax.numpy as jnp
from jax.experimental import pallas as pl
from jax.experimental.pallas import tpu as pltpu

MODS = ("text", "image", "audio")


def _round_up(x, m):
    return (x + m - 1) // m * m


def _cross_modal_kernel(
    # row tiles per modality (f32 [tile_n, D_m]) — cast to bf16 in-kernel
    xt_ref, xi_ref, xa_ref,
    # projection weights (bf16 [D_m, O])
    wt_ref, wi_ref, wa_ref,
    # folded attention vectors v_m = W_m @ att_w^T (bf16 [D_m, 1])
    vt_ref, vi_ref, va_ref,
    # packed projection biases (f32 [3, O])
    b_ref,
    # packed score constants c_m = b_m . att_w + att_b (f32 [3] in SMEM)
    c_ref,
    # output row tile (bf16 [tile_n, O])
    out_ref,
):
    # cast activations to bf16 immediately before the dots (halves MXU input width,
    # f32 never leaves HBM twice)
    xt = xt_ref[...].astype(jnp.bfloat16)
    xi = xi_ref[...].astype(jnp.bfloat16)
    xa = xa_ref[...].astype(jnp.bfloat16)

    # --- per-modality linear projections (bf16 x bf16 -> f32 accumulation, MXU) ---
    pt = jnp.dot(xt, wt_ref[...], preferred_element_type=jnp.float32) + b_ref[0:1, :]
    pi = jnp.dot(xi, wi_ref[...], preferred_element_type=jnp.float32) + b_ref[1:2, :]
    pa = jnp.dot(xa, wa_ref[...], preferred_element_type=jnp.float32) + b_ref[2:3, :]

    # --- attention scores: tanh(Linear(O -> 1)) folded into a matvec on x ---
    st = jnp.tanh(jnp.dot(xt, vt_ref[...], preferred_element_type=jnp.float32) + c_ref[0])
    si = jnp.tanh(jnp.dot(xi, vi_ref[...], preferred_element_type=jnp.float32) + c_ref[1])
    sa = jnp.tanh(jnp.dot(xa, va_ref[...], preferred_element_type=jnp.float32) + c_ref[2])

    # --- softmax over the modality axis (numerically stable) ---
    m = jnp.maximum(jnp.maximum(st, si), sa)
    et = jnp.exp(st - m)
    ei = jnp.exp(si - m)
    ea = jnp.exp(sa - m)
    inv_denom = pl.reciprocal(et + ei + ea, approx=True)  # EUP slot, ~2^-12 rel err

    # --- attention-weighted fusion over modalities (f32), store as bf16 ---
    fused = (pt * et + pi * ei + pa * ea) * inv_denom
    out_ref[...] = fused.astype(out_ref.dtype)


def cross_modal_projector(features, params, *, tile_n=None, out_dtype=jnp.bfloat16,
                          vmem_budget_bytes=24 * 1024 * 1024):
    """features: dict mod -> [B, S, D_mod] (f32); params: dict (see init_params).

    Kernel is specialized to the three-modality ("text", "image", "audio") case.
    """
    B, S, _ = features[MODS[0]].shape
    N = B * S
    O = params["att_w"].shape[-1]
    dims = [features[m].shape[-1] for m in MODS]

    # Flatten to row-major [N, D_m] views (no data movement / no dtype change).
    xs = [features[m].reshape(N, features[m].shape[-1]) for m in MODS]

    # Tiny constant operands: pre-cast weights to bf16, fold the attention head.
    ws = [params[f"W_{m}"].astype(jnp.bfloat16) for m in MODS]            # [D_m, O] bf16
    att_w = params["att_w"]                                                # [1, O]  f32
    att_b = params["att_b"].reshape(())                                    # scalar  f32
    vs = [(params[f"W_{m}"] @ att_w[0][:, None]).astype(jnp.bfloat16)      # [D_m, 1] bf16
          for m in MODS]
    b_cat = jnp.concatenate([params[f"b_{m}"] for m in MODS], axis=0)      # [3, O]  f32
    c = jnp.stack([jnp.sum(params[f"b_{m}"][0] * att_w[0]) + att_b         # [3]     f32
                   for m in MODS]).astype(jnp.float32)

    # Row tile: multiple of 16 (bf16 output packing), sized to the VMEM budget so the
    # double-buffered f32 input tiles + bf16 output tile + f32 intermediates fit
    # (budget default works within v7x's 32 MiB scoped default; raise on v5e/v6e).
    bytes_per_row = (2 * 4 * sum(dims)   # f32 input tiles, double-buffered
                     + 2 * 2 * O         # bf16 output tile, double-buffered
                     + 6 * 4 * O)        # f32 intermediates headroom
    tn_budget = max(16, vmem_budget_bytes // max(bytes_per_row, 1))
    tn_cap = tile_n if tile_n is not None else 1024  # keeps >=2 grid steps for large N (v7x 2 TCs)
    tn = min(tn_cap, tn_budget, _round_up(N, 16))
    tn = max(16, (tn // 16) * 16)

    grid = (pl.cdiv(N, tn),)  # partial tail block handled by Pallas (masked writeback)

    # Constant operands: constant index_map -> DMA'd once across the whole grid.
    const_bytes = (sum(2 * int(w.size) * 2 for w in ws)
                   + sum(2 * int(v.size) * 2 for v in vs)
                   + 2 * int(b_cat.size) * 4)
    vmem_limit = int((tn * bytes_per_row + const_bytes) * 1.5) + (2 << 20)
    vmem_limit = min(max(vmem_limit, 8 << 20), 64 << 20)

    def row_spec(d):
        return pl.BlockSpec((tn, d), lambda i: (i, 0))

    def const_spec(shape):
        return pl.BlockSpec(shape, lambda i: (0, 0))

    in_specs = [row_spec(d) for d in dims]
    in_specs += [const_spec(w.shape) for w in ws]
    in_specs += [const_spec(v.shape) for v in vs]
    in_specs += [const_spec(b_cat.shape)]
    in_specs += [pl.BlockSpec(memory_space=pltpu.MemorySpace.SMEM)]

    out = pl.pallas_call(
        _cross_modal_kernel,
        out_shape=jax.ShapeDtypeStruct((N, O), out_dtype),
        grid_spec=pltpu.PrefetchScalarGridSpec(
            num_scalar_prefetch=0,
            grid=grid,
            in_specs=in_specs,
            out_specs=pl.BlockSpec((tn, O), lambda i: (i, 0)),
        ),
        compiler_params=pltpu.CompilerParams(
            dimension_semantics=("parallel",),
            vmem_limit_bytes=vmem_limit,
        ),
    )(xs[0], xs[1], xs[2],
      ws[0], ws[1], ws[2],
      vs[0], vs[1], vs[2],
      b_cat, c)

    return out.reshape(B, S, O)


def init_params(key, input_dims, output_dim):
    params = {}
    for i, (mod, d) in enumerate(sorted(input_dims.items())):
        k_w, k_b = jax.random.split(jax.random.fold_in(key, i))
        bound = 1.0 / jnp.sqrt(d)
        params[f"W_{mod}"] = jax.random.uniform(
            k_w, (d, output_dim), jnp.float32, -bound, bound)
        params[f"b_{mod}"] = jax.random.uniform(
            k_b, (1, output_dim), jnp.float32, -bound, bound)
    k_aw, k_ab = jax.random.split(jax.random.fold_in(key, 100))
    bound = 1.0 / jnp.sqrt(output_dim)
    params["att_w"] = jax.random.uniform(
        k_aw, (1, output_dim), jnp.float32, -bound, bound)
    params["att_b"] = jax.random.uniform(
        k_ab, (1, 1), jnp.float32, -bound, bound)
    return params


def reference(features, params):
    """Pure-JAX f32 reference matching the PyTorch forward (dropout = identity)."""
    projected = [features[m] @ params[f"W_{m}"] + params[f"b_{m}"][0] for m in MODS]
    stacked = jnp.stack(projected, axis=-2)                       # [B, S, M, O]
    scores = jnp.tanh(
        jnp.sum(stacked * params["att_w"][0], axis=-1, keepdims=True)
        + params["att_b"][0, 0])                                  # [B, S, M, 1]
    weights = jax.nn.softmax(scores, axis=-2)
    return jnp.sum(stacked * weights, axis=-2)                    # [B, S, O]


if __name__ == "__main__":
    key = jax.random.PRNGKey(0)

    B, S, O = 2, 8, 32
    input_dims = {"text": 32, "image": 48, "audio": 16}

    params = init_params(key, input_dims, O)

    feat_keys = jax.random.split(jax.random.fold_in(key, 7), 3)
    features = {
        "text": jax.random.normal(feat_keys[0], (B, S, input_dims["text"]), jnp.float32),
        "image": jax.random.normal(feat_keys[1], (B, S, input_dims["image"]), jnp.float32),
        "audio": jax.random.normal(feat_keys[2], (B, S, input_dims["audio"]), jnp.float32),
    }

    out = cross_modal_projector(features, params)
    out = jax.block_until_ready(out)
    assert out.shape == (B, S, O)
    out_f32 = out.astype(jnp.float32)

    # Check against a reference fed bf16-rounded inputs/weights (isolates kernel logic
    # from the intentional bf16 compression; output itself is bf16-rounded too).
    feats_rounded = {m: features[m].astype(jnp.bfloat16).astype(jnp.float32)
                     for m in features}
    params_rounded = dict(params)
    for m in MODS:
        params_rounded[f"W_{m}"] = params[f"W_{m}"].astype(jnp.bfloat16).astype(jnp.float32)
    ref_bf16 = reference(feats_rounded, params_rounded)
    assert jnp.allclose(out_f32, ref_bf16, rtol=2e-2, atol=2e-2), \
        "mismatch vs bf16-rounded reference"

    # Loose sanity check against the full-precision reference (covers all bf16 rounding).
    ref_f32 = reference(features, params)
    assert jnp.allclose(out_f32, ref_f32, rtol=5e-2, atol=5e-2), "mismatch vs f32 reference"

    print("KERNEL_OK")
</pallas_src>

<mosaic_0001>
module attributes {stable_mosaic.version = 11 : i64} {
  func.func @_cross_modal_kernel(%arg0: i32, %arg1: memref<16x32xf32, #tpu.memory_space<vmem>>, %arg2: memref<16x48xf32, #tpu.memory_space<vmem>>, %arg3: memref<16x16xf32, #tpu.memory_space<vmem>>, %arg4: memref<32x32xbf16, #tpu.memory_space<vmem>>, %arg5: memref<48x32xbf16, #tpu.memory_space<vmem>>, %arg6: memref<16x32xbf16, #tpu.memory_space<vmem>>, %arg7: memref<32x1xbf16, #tpu.memory_space<vmem>>, %arg8: memref<48x1xbf16, #tpu.memory_space<vmem>>, %arg9: memref<16x1xbf16, #tpu.memory_space<vmem>>, %arg10: memref<3x32xf32, #tpu.memory_space<vmem>>, %arg11: memref<3xf32, #tpu.memory_space<smem>>, %arg12: memref<16x32xbf16, #tpu.memory_space<vmem>>) attributes {dimension_semantics = [#tpu.dimension_semantics<parallel>], iteration_bounds = array<i64: 1>, scalar_prefetch = 0 : i64, scratch_operands = 0 : i64, tpu.core_type = #tpu.core_type<tc>, window_params = [{transform_indices = @transform_0, window_bounds = array<i64: 16, 32>}, {transform_indices = @transform_1, window_bounds = array<i64: 16, 48>}, {transform_indices = @transform_2, window_bounds = array<i64: 16, 16>}, {pipeline_mode = #tpu.pipeline_mode<synchronous>, transform_indices = @transform_3, window_bounds = array<i64: 32, 32>}, {pipeline_mode = #tpu.pipeline_mode<synchronous>, transform_indices = @transform_4, window_bounds = array<i64: 48, 32>}, {pipeline_mode = #tpu.pipeline_mode<synchronous>, transform_indices = @transform_5, window_bounds = array<i64: 16, 32>}, {pipeline_mode = #tpu.pipeline_mode<synchronous>, transform_indices = @transform_6, window_bounds = array<i64: 32, 1>}, {pipeline_mode = #tpu.pipeline_mode<synchronous>, transform_indices = @transform_7, window_bounds = array<i64: 48, 1>}, {pipeline_mode = #tpu.pipeline_mode<synchronous>, transform_indices = @transform_8, window_bounds = array<i64: 16, 1>}, {pipeline_mode = #tpu.pipeline_mode<synchronous>, transform_indices = @transform_9, window_bounds = array<i64: 3, 32>}, {transform_indices = @transform_10, window_bounds = array<i64: 3>}, {transform_indices = @transform_11, window_bounds = array<i64: 16, 32>}]} {
    %c0 = arith.constant 0 : index
    %c0_0 = arith.constant 0 : index
    %0 = vector.load %arg1[%c0, %c0_0] : memref<16x32xf32, #tpu.memory_space<vmem>>, vector<16x32xf32>
    %1 = arith.truncf %0 : vector<16x32xf32> to vector<16x32xbf16>
    %c0_1 = arith.constant 0 : index
    %c0_2 = arith.constant 0 : index
    %2 = vector.load %arg2[%c0_1, %c0_2] : memref<16x48xf32, #tpu.memory_space<vmem>>, vector<16x48xf32>
    %3 = arith.truncf %2 : vector<16x48xf32> to vector<16x48xbf16>
    %c0_3 = arith.constant 0 : index
    %c0_4 = arith.constant 0 : index
    %4 = vector.load %arg3[%c0_3, %c0_4] : memref<16x16xf32, #tpu.memory_space<vmem>>, vector<16x16xf32>
    %5 = arith.truncf %4 : vector<16x16xf32> to vector<16x16xbf16>
    %c0_5 = arith.constant 0 : index
    %c0_6 = arith.constant 0 : index
    %6 = vector.load %arg4[%c0_5, %c0_6] : memref<32x32xbf16, #tpu.memory_space<vmem>>, vector<32x32xbf16>
    %cst = arith.constant dense<0.000000e+00> : vector<16x32xf32>
    %7 = tpu.matmul %1, %6, %cst {dimension_numbers = #tpu.dot_dimension_numbers<[1], [0], [0], [1], [0, 0, 1, 1], [], []>} : vector<16x32xbf16>, vector<32x32xbf16>, vector<16x32xf32> -> vector<16x32xf32>
    %c0_7 = arith.constant 0 : index
    %c0_8 = arith.constant 0 : index
    %8 = vector.load %arg10[%c0_7, %c0_8] : memref<3x32xf32, #tpu.memory_space<vmem>>, vector<1x32xf32>
    %9 = vector.broadcast %8 : vector<1x32xf32> to vector<16x32xf32>
    %10 = arith.addf %7, %9 : vector<16x32xf32>
    %c0_9 = arith.constant 0 : index
    %c0_10 = arith.constant 0 : index
    %11 = vector.load %arg5[%c0_9, %c0_10] : memref<48x32xbf16, #tpu.memory_space<vmem>>, vector<48x32xbf16>
    %cst_11 = arith.constant dense<0.000000e+00> : vector<16x32xf32>
    %12 = tpu.matmul %3, %11, %cst_11 {dimension_numbers = #tpu.dot_dimension_numbers<[1], [0], [0], [1], [0, 0, 1, 1], [], []>} : vector<16x48xbf16>, vector<48x32xbf16>, vector<16x32xf32> -> vector<16x32xf32>
    %c1 = arith.constant 1 : index
    %c0_12 = arith.constant 0 : index
    %13 = vector.load %arg10[%c1, %c0_12] : memref<3x32xf32, #tpu.memory_space<vmem>>, vector<1x32xf32>
    %14 = vector.broadcast %13 : vector<1x32xf32> to vector<16x32xf32>
    %15 = arith.addf %12, %14 : vector<16x32xf32>
    %c0_13 = arith.constant 0 : index
    %c0_14 = arith.constant 0 : index
    %16 = vector.load %arg6[%c0_13, %c0_14] : memref<16x32xbf16, #tpu.memory_space<vmem>>, vector<16x32xbf16>
    %cst_15 = arith.constant dense<0.000000e+00> : vector<16x32xf32>
    %17 = tpu.matmul %5, %16, %cst_15 {dimension_numbers = #tpu.dot_dimension_numbers<[1], [0], [0], [1], [0, 0, 1, 1], [], []>} : vector<16x16xbf16>, vector<16x32xbf16>, vector<16x32xf32> -> vector<16x32xf32>
    %c2 = arith.constant 2 : index
    %c0_16 = arith.constant 0 : index
    %18 = vector.load %arg10[%c2, %c0_16] : memref<3x32xf32, #tpu.memory_space<vmem>>, vector<1x32xf32>
    %19 = vector.broadcast %18 : vector<1x32xf32> to vector<16x32xf32>
    %20 = arith.addf %17, %19 : vector<16x32xf32>
    %c0_17 = arith.constant 0 : index
    %c0_18 = arith.constant 0 : index
    %21 = vector.load %arg7[%c0_17, %c0_18] : memref<32x1xbf16, #tpu.memory_space<vmem>>, vector<32x1xbf16>
    %cst_19 = arith.constant dense<0.000000e+00> : vector<16x1xf32>
    %22 = tpu.matmul %1, %21, %cst_19 {dimension_numbers = #tpu.dot_dimension_numbers<[1], [0], [0], [1], [0, 0, 1, 1], [], []>} : vector<16x32xbf16>, vector<32x1xbf16>, vector<16x1xf32> -> vector<16x1xf32>
    %c0_20 = arith.constant 0 : index
    %23 = memref.load %arg11[%c0_20] : memref<3xf32, #tpu.memory_space<smem>>
    %24 = vector.broadcast %23 : f32 to vector<16x1xf32>
    %25 = arith.addf %22, %24 : vector<16x1xf32>
    %26 = math.tanh %25 : vector<16x1xf32>
    %c0_21 = arith.constant 0 : index
    %c0_22 = arith.constant 0 : index
    %27 = vector.load %arg8[%c0_21, %c0_22] : memref<48x1xbf16, #tpu.memory_space<vmem>>, vector<48x1xbf16>
    %cst_23 = arith.constant dense<0.000000e+00> : vector<16x1xf32>
    %28 = tpu.matmul %3, %27, %cst_23 {dimension_numbers = #tpu.dot_dimension_numbers<[1], [0], [0], [1], [0, 0, 1, 1], [], []>} : vector<16x48xbf16>, vector<48x1xbf16>, vector<16x1xf32> -> vector<16x1xf32>
    %c1_24 = arith.constant 1 : index
    %29 = memref.load %arg11[%c1_24] : memref<3xf32, #tpu.memory_space<smem>>
    %30 = vector.broadcast %29 : f32 to vector<16x1xf32>
    %31 = arith.addf %28, %30 : vector<16x1xf32>
    %32 = math.tanh %31 : vector<16x1xf32>
    %c0_25 = arith.constant 0 : index
    %c0_26 = arith.constant 0 : index
    %33 = vector.load %arg9[%c0_25, %c0_26] : memref<16x1xbf16, #tpu.memory_space<vmem>>, vector<16x1xbf16>
    %cst_27 = arith.constant dense<0.000000e+00> : vector<16x1xf32>
    %34 = tpu.matmul %5, %33, %cst_27 {dimension_numbers = #tpu.dot_dimension_numbers<[1], [0], [0], [1], [0, 0, 1, 1], [], []>} : vector<16x16xbf16>, vector<16x1xbf16>, vector<16x1xf32> -> vector<16x1xf32>
    %c2_28 = arith.constant 2 : index
    %35 = memref.load %arg11[%c2_28] : memref<3xf32, #tpu.memory_space<smem>>
    %36 = vector.broadcast %35 : f32 to vector<16x1xf32>
    %37 = arith.addf %34, %36 : vector<16x1xf32>
    %38 = math.tanh %37 : vector<16x1xf32>
    %39 = arith.maximumf %26, %32 : vector<16x1xf32>
    %40 = arith.maximumf %39, %38 : vector<16x1xf32>
    %41 = arith.subf %26, %40 : vector<16x1xf32>
    %42 = math.exp %41 : vector<16x1xf32>
    %43 = arith.subf %32, %40 : vector<16x1xf32>
    %44 = math.exp %43 : vector<16x1xf32>
    %45 = arith.subf %38, %40 : vector<16x1xf32>
    %46 = math.exp %45 : vector<16x1xf32>
    %47 = arith.addf %42, %44 : vector<16x1xf32>
    %48 = arith.addf %47, %46 : vector<16x1xf32>
    %49 = tpu.reciprocal %48 {approx = true} : vector<16x1xf32> -> vector<16x1xf32>
    %50 = vector.broadcast %42 : vector<16x1xf32> to vector<16x32xf32>
    %51 = arith.mulf %10, %50 : vector<16x32xf32>
    %52 = vector.broadcast %44 : vector<16x1xf32> to vector<16x32xf32>
    %53 = arith.mulf %15, %52 : vector<16x32xf32>
    %54 = arith.addf %51, %53 : vector<16x32xf32>
    %55 = vector.broadcast %46 : vector<16x1xf32> to vector<16x32xf32>
    %56 = arith.mulf %20, %55 : vector<16x32xf32>
    %57 = arith.addf %54, %56 : vector<16x32xf32>
    %58 = vector.broadcast %49 : vector<16x1xf32> to vector<16x32xf32>
    %59 = arith.mulf %57, %58 : vector<16x32xf32>
    %60 = arith.truncf %59 : vector<16x32xf32> to vector<16x32xbf16>
    %c0_29 = arith.constant 0 : index
    %c0_30 = arith.constant 0 : index
    %61 = vector.load %arg12[%c0_29, %c0_30] : memref<16x32xbf16, #tpu.memory_space<vmem>>, vector<16x32xbf16>
    tpu.vector_store %arg12[%c0_29, %c0_30], %60 {strides = array<i32>} : memref<16x32xbf16, #tpu.memory_space<vmem>>, vector<16x32xbf16>,
    return
  }
  func.func @transform_0(%arg0: i32) -> (i32, i32) {
    %c0_i32 = arith.constant 0 : i32
    %c0_i32_0 = arith.constant 0 : i32
    return %arg0, %c0_i32 : i32, i32
  }
  func.func @transform_1(%arg0: i32) -> (i32, i32) {
    %c0_i32 = arith.constant 0 : i32
    %c0_i32_0 = arith.constant 0 : i32
    return %arg0, %c0_i32 : i32, i32
  }
  func.func @transform_2(%arg0: i32) -> (i32, i32) {
    %c0_i32 = arith.constant 0 : i32
    %c0_i32_0 = arith.constant 0 : i32
    return %arg0, %c0_i32 : i32, i32
  }
  func.func @transform_3(%arg0: i32) -> (i32, i32) {
    %c0_i32 = arith.constant 0 : i32
    %c0_i32_0 = arith.constant 0 : i32
    %c0_i32_1 = arith.constant 0 : i32
    return %c0_i32, %c0_i32_0 : i32, i32
  }
  func.func @transform_4(%arg0: i32) -> (i32, i32) {
    %c0_i32 = arith.constant 0 : i32
    %c0_i32_0 = arith.constant 0 : i32
    %c0_i32_1 = arith.constant 0 : i32
    return %c0_i32, %c0_i32_0 : i32, i32
  }
  func.func @transform_5(%arg0: i32) -> (i32, i32) {
    %c0_i32 = arith.constant 0 : i32
    %c0_i32_0 = arith.constant 0 : i32
    %c0_i32_1 = arith.constant 0 : i32
    return %c0_i32, %c0_i32_0 : i32, i32
  }
  func.func @transform_6(%arg0: i32) -> (i32, i32) {
    %c0_i32 = arith.constant 0 : i32
    %c0_i32_0 = arith.constant 0 : i32
    %c0_i32_1 = arith.constant 0 : i32
    return %c0_i32, %c0_i32_0 : i32, i32
  }
  func.func @transform_7(%arg0: i32) -> (i32, i32) {
    %c0_i32 = arith.constant 0 : i32
    %c0_i32_0 = arith.constant 0 : i32
    %c0_i32_1 = arith.constant 0 : i32
    return %c0_i32, %c0_i32_0 : i32, i32
  }
  func.func @transform_8(%arg0: i32) -> (i32, i32) {
    %c0_i32 = arith.constant 0 : i32
    %c0_i32_0 = arith.constant 0 : i32
    %c0_i32_1 = arith.constant 0 : i32
    return %c0_i32, %c0_i32_0 : i32, i32
  }
  func.func @transform_9(%arg0: i32) -> (i32, i32) {
    %c0_i32 = arith.constant 0 : i32
    %c0_i32_0 = arith.constant 0 : i32
    %c0_i32_1 = arith.constant 0 : i32
    return %c0_i32, %c0_i32_0 : i32, i32
  }
  func.func @transform_10(%arg0: i32) -> i32 {
    %c0_i32 = arith.constant 0 : i32
    %c0_i32_0 = arith.constant 0 : i32
    return %c0_i32 : i32
  }
  func.func @transform_11(%arg0: i32) -> (i32, i32) {
    %c0_i32 = arith.constant 0 : i32
    %c0_i32_0 = arith.constant 0 : i32
    return %arg0, %c0_i32 : i32, i32
  }
}

</mosaic_0001>

<bundles_post_ra>
// kernel: tpu_custom_call.1
= control target key start
LH: loop header
LB: loop body
LE: loop exit
PB: predicated region body
PF: predicated region fallthrough
CT: control target
= control target key end

     0   :  { %16 = vsyncpa [#allocation4], 0  ;;  %s906_s0 = inlined_call_operand.vmem [shape: f32[16,32], index: 0, kind: input, shape index: {}]   ;;  %s907_s1 = inlined_call_operand.vmem [shape: f32[16,48], index: 1, kind: input, shape index: {}]   ;;  %s908_s2 = inlined_call_operand.vmem [shape: f32[16,16], index: 2, kind: input, shape index: {}]   ;;  %s909_s3 = inlined_call_operand.vmem [shape: bf16[32,32], index: 3, kind: input, shape index: {}]   ;;  %s910_s4 = inlined_call_operand.vmem [shape: bf16[48,32], index: 4, kind: input, shape index: {}]   ;;  %s911_s5 = inlined_call_operand.vmem [shape: bf16[16,32], index: 5, kind: input, shape index: {}]   ;;  %s912_s6 = inlined_call_operand.vmem [shape: bf16[32,1], index: 6, kind: input, shape index: {}]   ;;  %s913_s7 = inlined_call_operand.vmem [shape: bf16[48,1], index: 7, kind: input, shape index: {}]   ;;  %s914_s8 = inlined_call_operand.vmem [shape: bf16[16,1], index: 8, kind: input, shape index: {}]   ;;  %s915_s9 = inlined_call_operand.vmem [shape: f32[3,32], index: 9, kind: input, shape index: {}]   ;;  %s916_s10 = inlined_call_operand.vmem [shape: f32[3], index: 10, kind: input, shape index: {}]   ;;  %s917_s11 = inlined_call_operand.hbm [shape: bf16[16,32], index: 11, kind: output, shape index: {}]  }
   0x1   :  { %17 = vsyncpa [#allocation3], 0  ;;  %s44_s19 = sshll.u32 %s916_s10, 4  ;;  %s45_s19 = int_to_ptr.vmem [resolvable:$true] %s44_s19 }
   0x2   :  { %s693_s20 = scalar_lea.vmem %s45_s19, 16  ;;  %p698_p1 = scmp.lt.s32.totalorder %s45_s19, %s45_s19 }
   0x3   :  { %p694_p0 = scmp.ne.s32.totalorder %s45_s19, %s693_s20  ;;  %p699_p2 = scmp.lt.s32.totalorder %s693_s20, %s693_s20 }
   0x5   :  { %p700_p3 = por %p699_p2, %p698_p1 }
   0x7   :  { %p701_p4 = pnand %p700_p3, %p694_p0 }
   0x9   :  { %704 = shalt.err (!%p701_p4)
}
   0xa   :  { %s731_s21 = smov [#allocation2]  }
   0xb   :  { %47 = dma.vmem_to_smem %s45_s19, 16, %s731_s21, [#allocation4]  }
   0xc   :  { %727 = dma.done.wait [#allocation4], 16  }
   0xd   :  { %728 = vsyncadd [#allocation4], 4294967280 }
   0xe   :  { %51 = sfence }
   0xf   :  { %v653_v0 = vld [vmem:[%s909_s3] sm:$0xff]   ;;  %v732_v1 = vmov 0.0   ;;  %v655_v3 = vld [vmem:[%s909_s3 + $0x8] sm:$0xff]   ;;  %vm733_vm0 = vmmov 0   ;;  %v657_v8 = vld [vmem:[%s910_s4 + $0x10] sm:$0xff]   ;;  %vm83_vm1 = vcmask 261120  }
  0x10   :  { %596 = vmatprep.subr.bf16.mxu0 %v732_v1  ;;  %604 = vmatprep.subr.bf16.mxu1 %v732_v1  ;;  %v654_v2 = vld [vmem:[%s910_s4] sm:$0xff]   ;;  %v656_v4 = vld [vmem:[%s910_s4 + $0x8] sm:$0xff]   ;;  %vm157_vm2 = vcmask 392192   ;;  %vm215_vm3 = vcmask 130048   ;;  %v664_v21 = vld [vmem:[%s913_s7 + $0x10] sm:$0xff]   ;;  %v734_v22 = vmov 0  }
  0x11   :  { %597 = vmatpush3.bf16.msra.mxu0 %v653_v0  ;;  %600 = vmatprep.mubr.msk.bf16.mxu0 %vm733_vm0, %v732_v1  ;;  %v53_v5 = vld [vmem:[%s906_s0] sm:$0xff]  ;;  %v54_v6 = vld [vmem:[%s906_s0 + $0x8] sm:$0xff]  ;;  %s571_s30 = sld [smem:[#allocation2 + $0x2]]  ;;  %vm531_vm4 = vcmask 257024  }
  0x12   :  { %605 = vmatpush3.bf16.msra.mxu1 %v654_v2  ;;  %598 = vmatprep.subr.bf16.mxu0 %v732_v1  ;;  %v55_v7 = vpack.c.bf16 %v54_v6, %v53_v5  ;;  %v658_v9 = vld [vmem:[%s911_s5] sm:$0xff]   ;;  %v57_v11 = vld [vmem:[%s907_s1 + $0x8] sm:$0xff] }
  0x13   :  { %606 = vmatprep.subr.bf16.mxu1 %v732_v1  ;;  %610 = vmatprep.mubr.msk.bf16.mxu1 %vm733_vm0, %v732_v1  ;;  %v56_v10 = vld [vmem:[%s907_s1] sm:$0xff]  ;;  %v60_v14 = vld [vmem:[%s908_s2 + $0x8] sm:$0xff] }
  0x14   :  { %v59_v12 = vld [vmem:[%s908_s2] sm:$0xff]  ;;  %v58_v13 = vpack.c.bf16 %v57_v11, %v56_v10  ;;  %v661_v18 = vld [vmem:[%s912_s6 + $0x8] sm:$0xff]   ;;  %652 = vset.pattern.permute.xlu1 %v734_v22  ;;  %651 = vset.pattern.permute.xlu0 %v734_v22 }
  0x15   :  { %599 = vmatpush3.bf16.msra.mxu0 %v655_v3  ;;  %v659_v15 = vld [vmem:[%s912_s6] sm:$0xff]   ;;  %v61_v16 = vpack.c.bf16 %v60_v14, %v59_v12  ;;  %v662_v19 = vld [vmem:[%s913_s7 + $0x8] sm:$0xff]  }
  0x16   :  { %607 = vmatpush3.bf16.msra.mxu1 %v656_v4  ;;  %614 = vmatprep.subr.bf16.mxu0 %v732_v1  ;;  %v660_v17 = vld [vmem:[%s913_s7] sm:$0xff]   ;;  %s264_s7 = sld [smem:[#allocation2]] }
  0x17   :  { %608 = vmatprep.subr.bf16.mxu1 %v732_v1  ;;  %v663_v20 = vld [vmem:[%s914_s8] sm:$0xff]   ;;  %s566_s8 = sld [smem:[#allocation2 + $0x1]]  ;;  %v393_v43 = vstv %s571_s30 }
  0x18   :  { %601 = vmatmul.mubr.msk.bf16.vlgmr.msra.gmra.mrb[0].mxu0 %vm83_vm1, %v55_v7 }
  0x19   :  { %615 = vmatpush3.bf16.msra.mxu0 %v658_v9  ;;  %616 = vmatprep.mubr.msk.bf16.mxu0 %vm733_vm0, %v732_v1 }
  0x1a   :  { %609 = vmatpush3.bf16.msra.mxu1 %v657_v8  ;;  %628 = vmatprep.subr.bf16.mxu0 %v732_v1 }
  0x1b   :  { %620 = vmatprep.subr.bf16.mxu1 %v732_v1 }
  0x1c   :  { %v265_v36 = vstv %s264_s7 }
  0x1d   :  { %611 = vmatmul.mubr.msk.bf16.vlgmr.msra.gmra.mrb[0].mxu1 %vm157_vm2, %v58_v13  ;;  %v328_v42 = vstv %s566_s8 }
  0x1e   :  { %621 = vmatpush3.bf16.msra.mxu1 %v659_v15  ;;  %624 = vmatprep.mubr.msk.bf16.mxu1 %vm733_vm0, %v732_v1 }
  0x1f   :  { %622 = vmatprep.subr.bf16.mxu1 %v732_v1 }
  0x20   :  { %617 = vmatmul.mubr.msk.bf16.vlgmr.msra.gmra.mrb[4].mxu0 %vm215_vm3, %v61_v16 }
  0x21   :  { %629 = vmatpush3.bf16.msra.mxu0 %v660_v17  ;;  %634 = vmatprep.mubr.msk.bf16.mxu0 %vm733_vm0, %v732_v1 }
  0x22   :  { %623 = vmatpush3.bf16.msra.mxu1 %v661_v18  ;;  %630 = vmatprep.subr.bf16.mxu0 %v732_v1 }
  0x23   :  { %638 = vmatprep.subr.bf16.mxu1 %v732_v1 }
  0x25   :  { %625 = vmatmul.mubr.msk.bf16.vlgmr.msra.gmra.mrb[4].mxu1 %vm83_vm1, %v55_v7  ;;  %631 = vmatpush3.bf16.msra.mxu0 %v662_v19 }
  0x26   :  { %639 = vmatpush3.bf16.msra.mxu1 %v663_v20  ;;  %632 = vmatprep.subr.bf16.mxu0 %v732_v1 }
  0x27   :  { %640 = vmatprep.mubr.msk.bf16.mxu1 %vm733_vm0, %v732_v1 }
  0x29   :  { %633 = vmatpush3.bf16.msra.mxu0 %v664_v21 }
  0x2c   :  { %635 = vmatmul.mubr.msk.bf16.vlgmr.msra.gmra.mrb[8].mxu0 %vm157_vm2, %v58_v13 }
  0x2d   :  { %641 = vmatmul.mubr.msk.bf16.vlgmr.msra.gmra.mrb[8].mxu1 %vm215_vm3, %v61_v16 }
  0xeb   :  { %v867_v23 = vpop.f32.mrb[0].mxu0 }
  0xec   :  { %v602_v24 = vpop.f32.mrb[1].mxu0 }
  0xed   :  { %v869_v25 = vpop.f32.mrb[2].mxu0 }
  0xee   :  { %v603_v26 = vpop.f32.mrb[3].mxu0 }
  0xf0   :  { %v871_v27 = vpop.f32.mrb[0].mxu1 }
  0xf1   :  { %v612_v28 = vpop.f32.mrb[1].mxu1 }
  0xf2   :  { %v873_v29 = vpop.f32.mrb[2].mxu1 }
  0xf3   :  { %v613_v30 = vpop.f32.mrb[3].mxu1  ;;  %v875_v31 = vpop.f32.mrb[4].mxu0 }
  0xf4   :  { %v618_v32 = vpop.f32.mrb[5].mxu0  ;;  %v555_v30 = vld [vmem:[%s915_s9 + $0x1] ss:$0 sm:$0xff] }
  0xf5   :  { %v877_v33 = vpop.f32.mrb[6].mxu0  ;;  %v551_v32 = vld [vmem:[%s915_s9] ss:$0 sm:$0xff] }
  0xf6   :  { %v619_v34 = vpop.f32.mrb[7].mxu0 }
  0xf8   :  { %v312_v35 = vpop.f32.mrb[4].mxu1 }
  0xf9   :  { %v626_v37 = vpop.f32.mrb[5].mxu1  ;;  %v313_v40 = vadd.f32 %v312_v35, %v265_v36  ;;  %v196_v35 = vadd.f32 %v555_v30, %v871_v27 }
  0xfa   :  { %v315_v38 = vpop.f32.mrb[6].mxu1 }
  0xfb   :  { %v627_v39 = vpop.f32.mrb[7].mxu1  ;;  %v316_v41 = vadd.f32 %v315_v38, %v265_v36  ;;  %665 = vtanh.f32 %v313_v40  ;;  %v122_v36 = vadd.f32 %v551_v32, %v867_v23  ;;  %v199_v40 = vadd.f32 %v555_v30, %v873_v29 }
  0xfd   :  { %667 = vtanh.f32 %v316_v41 }
  0xff   :  { %v381_v44 = vpop.f32.mrb[8].mxu0 }
 0x100   :  { %v382_v45 = vadd.f32 %v381_v44, %v328_v42  ;;  %v636_v46 = vpop.f32.mrb[9].mxu0  ;;  %v434_v47 = vpop.f32.mrb[8].mxu1 }
 0x101   :  { %v435_v48 = vadd.f32 %v434_v47, %v393_v43  ;;  %v384_v49 = vpop.f32.mrb[10].mxu0  ;;  %v642_v50 = vpop.f32.mrb[9].mxu1 }
 0x102   :  { %669 = vtanh.f32 %v382_v45  ;;  %v385_v51 = vadd.f32 %v384_v49, %v328_v42  ;;  %v637_v52 = vpop.f32.mrb[11].mxu0  ;;  %v437_v53 = vpop.f32.mrb[10].mxu1  ;;  %v560_v42 = vld [vmem:[%s915_s9 + $0x2] ss:$0 sm:$0xff]  ;;  %s735_s9 = smov [#allocation5]  }
 0x103   :  { %671 = vtanh.f32 %v435_v48  ;;  %v438_v54 = vadd.f32 %v437_v53, %v393_v43  ;;  %v643_v55 = vpop.f32.mrb[11].mxu1  ;;  %v125_v43 = vadd.f32 %v551_v32, %v869_v25  ;;  %v257_v44 = vadd.f32 %v560_v42, %v877_v33  ;;  %s539_s17 = sshll.u32 %s735_s9, 4  ;;  %s540_s17 = int_to_ptr.vmem [resolvable:$true] %s539_s17 }
 0x104   :  { %673 = vtanh.f32 %v385_v51  ;;  %v254_v49 = vadd.f32 %v560_v42, %v875_v31  ;;  %s705_s18 = scalar_lea.vmem %s540_s17, 128  ;;  %p710_p6 = scmp.lt.s32.totalorder %s540_s17, %s540_s17 }
 0x105   :  { %675 = vtanh.f32 %v438_v54  ;;  %v666_v56 = vpop.eup %665  ;;  %p706_p5 = scmp.ne.s32.totalorder %s540_s17, %s705_s18  ;;  %p711_p7 = scmp.lt.s32.totalorder %s705_s18, %s705_s18 }
 0x107   :  { %v668_v57 = vpop.eup %667  ;;  %p712_p8 = por %p711_p7, %p710_p6 }
 0x109   :  { %p713_p9 = pnand %p712_p8, %p706_p5 }
 0x10c   :  { %v670_v58 = vpop.eup %669 }
 0x10d   :  { %v672_v59 = vpop.eup %671  ;;  %v443_v60 = vmax.f32 %v666_v56, %v670_v58 }
 0x10e   :  { %v674_v61 = vpop.eup %673 }
 0x10f   :  { %v676_v62 = vpop.eup %675  ;;  %v445_v63 = vmax.f32 %v443_v60, %v672_v59  ;;  %v444_v0 = vmax.f32 %v668_v57, %v674_v61 }
 0x111   :  { %v459_v1 = vsub.f32 %v672_v59, %v445_v63  ;;  %v446_v2 = vmax.f32 %v444_v0, %v676_v62  ;;  %v453_v3 = vsub.f32 %v670_v58, %v445_v63  ;;  %v447_v4 = vsub.f32 %v666_v56, %v445_v63 }
 0x113   :  { %v448_v5 = vsub.f32 %v668_v57, %v446_v2  ;;  %v454_v6 = vsub.f32 %v674_v61, %v446_v2  ;;  %v460_v7 = vsub.f32 %v676_v62, %v446_v2  ;;  %v455_v8 = vmul.f32 1.442695, %v453_v3 }
 0x114   :  { %v449_v12 = vmul.f32 1.442695, %v447_v4  ;;  %v461_v13 = vmul.f32 1.442695, %v459_v1 }
 0x115   :  { %v451_v9 = vmul.f32 1.442695, %v448_v5  ;;  %v457_v10 = vmul.f32 1.442695, %v454_v6  ;;  %v463_v11 = vmul.f32 1.442695, %v460_v7  ;;  %677 = vpow2.f32 %v455_v8 }
 0x117   :  { %679 = vpow2.f32 %v451_v9 }
 0x118   :  { %681 = vpow2.f32 %v457_v10 }
 0x119   :  { %683 = vpow2.f32 %v463_v11 }
 0x11a   :  { %685 = vpow2.f32 %v449_v12 }
 0x11b   :  { %687 = vpow2.f32 %v461_v13 }
 0x11f   :  { %v678_v14 = vpop.eup %677 }
 0x120   :  { %485 = vperm.xlu1 %652, %v678_v14  }
 0x121   :  { %v680_v15 = vpop.eup %679 }
 0x122   :  { %v682_v16 = vpop.eup %681 }
 0x123   :  { %v684_v17 = vpop.eup %683  ;;  %v466_v18 = vadd.f32 %v682_v16, %v680_v15 }
 0x124   :  { %v686_v19 = vpop.eup %685  ;;  %490 = vperm.xlu1 %652, %v682_v16  }
 0x125   :  { %v468_v20 = vadd.f32 %v684_v17, %v466_v18  ;;  %473 = vperm.xlu0 %651, %v686_v19   ;;  %v465_v21 = vadd.f32 %v686_v19, %v678_v14  ;;  %v688_v22 = vpop.eup %687 }
 0x127   :  { %v467_v24 = vadd.f32 %v688_v22, %v465_v21  ;;  %689 = vrcp.f32 %v468_v20 }
 0x128   :  { %504 = vperm.xlu1 %652, %v684_v17  }
 0x129   :  { %691 = vrcp.f32 %v467_v24  ;;  %478 = vperm.xlu0 %651, %v680_v15  }
 0x12d   :  { %499 = vperm.xlu0 %651, %v688_v22  }
 0x131   :  { %v690_v26 = vpop.eup %689 }
 0x132   :  { %518 = vperm.xlu1 %652, %v690_v26  }
 0x133   :  { %v692_v28 = vpop.eup %691 }
 0x134   :  { %513 = vperm.xlu0 %651, %v692_v28  }
 0x19f   :  { %v486_v34 = vpop.permute.xlu1 %485 }
 0x1a0   :  { %v493_v37 = vmul.f32 %v486_v34, %v196_v35 }
 0x1a3   :  { %v491_v39 = vpop.permute.xlu1 %490 }
 0x1a4   :  { %v474_v38 = vpop.permute.xlu0 %473  ;;  %v494_v46 = vmul.f32 %v491_v39, %v199_v40 }
 0x1a5   :  { %v481_v41 = vmul.f32 %v474_v38, %v122_v36 }
 0x1a7   :  { %v495_v45 = vadd.f32 %v493_v37, %v481_v41  ;;  %v505_v27 = vpop.permute.xlu1 %504 }
 0x1a8   :  { %v479_v47 = vpop.permute.xlu0 %478  ;;  %v508_v23 = vmul.f32 %v505_v27, %v257_v44 }
 0x1a9   :  { %v482_v48 = vmul.f32 %v479_v47, %v125_v43 }
 0x1ab   :  { %v496_v50 = vadd.f32 %v494_v46, %v482_v48 }
 0x1ac   :  { %v500_v51 = vpop.permute.xlu0 %499 }
 0x1ad   :  { %v507_v29 = vmul.f32 %v500_v51, %v254_v49  ;;  %v510_v52 = vadd.f32 %v508_v23, %v496_v50 }
 0x1af   :  { %v509_v53 = vadd.f32 %v507_v29, %v495_v45 }
 0x1b1   :  { %v519_v54 = vpop.permute.xlu1 %518 }
 0x1b2   :  { %v522_v55 = vmul.f32 %v519_v54, %v510_v52 }
 0x1b3   :  { %v514_v56 = vpop.permute.xlu0 %513 }
 0x1b4   :  { %v521_v25 = vmul.f32 %v514_v56, %v509_v53  ;;  %v577_v33 = vpack.c.bf16 %v522_v55, %v522_v55 }
 0x1b6   :  { %v576_v57 = vpack.c.bf16 %v521_v25, %v521_v25  ;;  %533 = vst.msk [vmem:[#allocation5 + $0x4] sm:$0xf] %vm531_vm4, %v577_v33 }
 0x1b8   :  { %532 = vst.msk [vmem:[#allocation5] sm:$0xf] %vm531_vm4, %v576_v57 }
 0x1b9   :  { %716 = shalt.err (!%p713_p9)
}
 0x1ba   :  { %s717_s4 = scalar_lea.hbm %s917_s11, 128 }
 0x1bb   :  { %p718_p10 = scmp.ne.s32.totalorder %s917_s11, %s717_s4  ;;  %p721_p11 = scmp.lt.u32.totalorder %s717_s4, %s917_s11 }
 0x1bd   :  { %p723_p12 = pnand %p721_p11, %p718_p10 }
 0x1bf   :  { %726 = shalt.err (!%p723_p12)
}
 0x1c0   :  { %s736_s23 = smov 64   ;;  %s737_s1 = smov 4  }
 0x1c1   :  { %545 = dma.vmem_to_hbm [thread:$0]  %s540_s17, 128, %s917_s11, [#allocation3], %s736_s23, %s736_s23, %s737_s1  }
 0x1c2   :  { %729 = dma.done.wait [#allocation3], 128  }
 0x1c3   :  { %730 = vsyncadd [#allocation3], 4294967168 }
 0x1c4   :  { %549 = vsyncpa [#allocation3], 1 }
 0x1c5   :  { %550 = vsyncpa [#allocation4], 1 }

</bundles_post_ra>
